<compile_context>
chip_gen: v5e
topology: v5e:2x2
jax: 0.10.0
libtpu: 0.0.40
codegen_flags: <defaults>
</compile_context>

<pallas_src>
import math
import functools

import jax
import jax.numpy as jnp
from jax import lax
from jax.experimental import pallas as pl
from jax.experimental.pallas import tpu as pltpu


# ------------------------------- helpers --------------------------------------
def _tile(dim, preferred, align):
    """Largest `align`-multiple tile <= preferred that evenly divides dim.

    Falls back to the full extent only if no aligned divisor exists (correct,
    just un-pipelined) or if dim <= preferred.
    """
    if dim <= preferred:
        return dim
    t = (preferred // align) * align
    while t >= align:
        if dim % t == 0:
            return t
        t -= align
    return dim


@functools.lru_cache(maxsize=None)
def _vmem_cap_bytes():
    """Generation-aware VMEM cap: 3/4 of physical VMEM (headroom for Mosaic)."""
    cap = None
    try:
        cap = getattr(pltpu.get_tpu_info(), "vmem_capacity_bytes", None)
    except Exception:
        cap = None
    if not cap:
        cap = 64 << 20          # conservative default: v7x per-TensorCore VMEM
    return int(cap) * 3 // 4    # ~48 MiB on v7x, ~96 MiB on v5e/v6e


def _vmem_limit(nbytes):
    return int(min(max(2 * nbytes, 16 << 20), _vmem_cap_bytes()))


# ----------------------------- tiled linear (y = x @ W + b) -------------------
def _linear_kernel(x_ref, w_ref, b_ref, o_ref, acc_ref):
    @pl.when(pl.program_id(2) == 0)
    def _():
        acc_ref[...] = jnp.zeros_like(acc_ref)

    acc_ref[...] += jnp.dot(x_ref[...], w_ref[...],
                            preferred_element_type=jnp.float32)

    @pl.when(pl.program_id(2) == pl.num_programs(2) - 1)
    def _():
        o_ref[...] = (acc_ref[...] + b_ref[...].astype(jnp.float32)
                      ).astype(o_ref.dtype)


def linear(x2d, w, b, *, out_dtype=None, tm=512, tn=512, tk=512):
    """y = x2d @ w + b.  x2d: (M, K), w: (K, N), b: (N,) f32.

    Tiled accumulator matmul (reduction axis last, f32 VMEM accumulator,
    pl.when init / last-k writeback). Operands stay in their (bf16) dtype.
    """
    M, K = x2d.shape
    N = w.shape[1]
    out_dtype = out_dtype or x2d.dtype
    tm = _tile(M, tm, 8)
    tn = _tile(N, tn, 128)
    tk = _tile(K, tk, 128)
    grid = (M // tm, N // tn, K // tk)

    itm = x2d.dtype.itemsize
    tile_bytes = (2 * itm * (tm * tk + tk * tn)                 # dbl-buffered x, w
                  + 2 * tm * tn * jnp.dtype(out_dtype).itemsize  # dbl-buffered out
                  + 2 * tn * 4                                   # bias
                  + tm * tn * 4)                                 # f32 accumulator

    return pl.pallas_call(
        _linear_kernel,
        out_shape=jax.ShapeDtypeStruct((M, N), out_dtype),
        grid_spec=pltpu.PrefetchScalarGridSpec(
            num_scalar_prefetch=0,
            grid=grid,
            in_specs=[
                pl.BlockSpec((tm, tk), lambda i, j, kk: (i, kk)),
                pl.BlockSpec((tk, tn), lambda i, j, kk: (kk, j)),
                pl.BlockSpec((1, tn), lambda i, j, kk: (0, j)),
            ],
            out_specs=pl.BlockSpec((tm, tn), lambda i, j, kk: (i, j)),
            scratch_shapes=[pltpu.VMEM((tm, tn), jnp.float32)],
        ),
        compiler_params=pltpu.CompilerParams(
            dimension_semantics=("parallel", "parallel", "arbitrary"),
            vmem_limit_bytes=_vmem_limit(tile_bytes),
        ),
    )(x2d, w, b.reshape(1, N).astype(jnp.float32))


# ------------------- flash-style scaled dot-product attention -----------------
def _flash_attn_kernel(q_ref, k_ref, v_ref, o_ref, m_sc, l_sc, acc_sc, *, num_heads):
    """Online-softmax attention; one (B, q-tile, KV-tile) grid step, all heads.

    Heads are iterated with a rolled lax.fori_loop so only one head's
    (tq, tks) f32 score/p block is live at a time (bounds vreg live ranges).
    1/sqrt(hd) is already folded into the Q projection weights.
    """
    ki = pl.program_id(2)
    head_dim = acc_sc.shape[-1]

    @pl.when(ki == 0)
    def _():
        m_sc[...] = jnp.full_like(m_sc, -jnp.inf)
        l_sc[...] = jnp.zeros_like(l_sc)
        acc_sc[...] = jnp.zeros_like(acc_sc)

    def head_body(h, carry):
        q = q_ref[h]                                           # (tq, hd)  bf16
        k = k_ref[h]                                           # (tks, hd) bf16
        v = v_ref[h]                                           # (tks, hd) bf16
        s = jnp.einsum("td,sd->ts", q, k,
                       preferred_element_type=jnp.float32)     # (tq, tks) f32
        m_prev = m_sc[h]                                       # (tq, 1)
        m_new = jnp.maximum(m_prev, s.max(axis=-1, keepdims=True))
        alpha = jnp.exp(m_prev - m_new)
        # TODO(synk): bf16 exp on v6e/v7x roughly doubles EUP throughput.
        p = jnp.exp(s - m_new)                                 # (tq, tks) f32
        l_sc[h] = alpha * l_sc[h] + p.sum(axis=-1, keepdims=True)
        acc_sc[h] = alpha * acc_sc[h] + jnp.einsum(
            "ts,sd->td", p.astype(v.dtype), v,
            preferred_element_type=jnp.float32)
        m_sc[h] = m_new
        return carry

    lax.fori_loop(0, num_heads, head_body, 0)

    @pl.when(ki == pl.num_programs(2) - 1)
    def _():
        # Writeback in (tq, H*hd) = (tq, C) layout: output is already (B, T, C),
        # so no JAX-side head-merge transpose afterwards.
        # pl.reciprocal(approx=True): ~1e-3 rel error, fine for bf16 outputs.
        for h in range(num_heads):                             # static loop
            o_ref[:, h * head_dim:(h + 1) * head_dim] = (
                acc_sc[h] * pl.reciprocal(l_sc[h], approx=True)
            ).astype(o_ref.dtype)


def sdpa(q, k, v, *, tq=256, tks=512):
    """q: (B,H,T,hd), k/v: (B,H,S,hd) -> (B,T,H*hd). Non-causal, no mask.

    Scale is assumed pre-folded into q (via the projection weights).
    """
    B, H, T, hd = q.shape
    S = k.shape[2]
    C = H * hd
    tq = _tile(T, tq, 8)
    tks = _tile(S, tks, 8)

    itm = q.dtype.itemsize
    tile_bytes = (2 * itm * (H * tq * hd + 2 * H * tks * hd + tq * C)  # q, k, v, o (x2 buf)
                  + 4 * (H * tq * hd + 2 * H * tq * 128)               # acc + m/l (lane-padded)
                  + 4 * 2 * tq * tks)                                  # per-head s/p live set

    kernel = functools.partial(_flash_attn_kernel, num_heads=H)
    return pl.pallas_call(
        kernel,
        out_shape=jax.ShapeDtypeStruct((B, T, C), q.dtype),
        grid_spec=pltpu.PrefetchScalarGridSpec(
            num_scalar_prefetch=0,
            grid=(B, T // tq, S // tks),
            in_specs=[
                pl.BlockSpec((None, H, tq, hd), lambda b, qi, ki: (b, 0, qi, 0)),
                pl.BlockSpec((None, H, tks, hd), lambda b, qi, ki: (b, 0, ki, 0)),
                pl.BlockSpec((None, H, tks, hd), lambda b, qi, ki: (b, 0, ki, 0)),
            ],
            out_specs=pl.BlockSpec((None, tq, C), lambda b, qi, ki: (b, qi, 0)),
            scratch_shapes=[
                pltpu.VMEM((H, tq, 1), jnp.float32),    # running max m
                pltpu.VMEM((H, tq, 1), jnp.float32),    # running denom l
                pltpu.VMEM((H, tq, hd), jnp.float32),   # running numerator
            ],
        ),
        compiler_params=pltpu.CompilerParams(
            dimension_semantics=("parallel", "parallel", "arbitrary"),
            vmem_limit_bytes=_vmem_limit(tile_bytes),
        ),
    )(q, k, v)


# --------------------------------- module -------------------------------------
class MultiHeadAttentionPallas:
    """Pallas-TPU equivalent of the PyTorch MultiHeadAttention module."""

    def __init__(self, d_model, num_heads, key, compute_dtype=jnp.bfloat16):
        assert d_model % num_heads == 0
        self.d_model = d_model
        self.num_heads = num_heads
        self.head_dim = d_model // num_heads
        self.compute_dtype = compute_dtype
        ks = jax.random.split(key, 8)
        std = 0.02

        def mk_w(k):   # stored transposed vs PyTorch: (in, out)
            return jax.random.normal(k, (d_model, d_model), jnp.float32) * std

        def mk_b(k):
            return jax.random.normal(k, (d_model,), jnp.float32) * std

        # f32 masters (also used by the pure-JAX reference).
        self.wq, self.bq = mk_w(ks[0]), mk_b(ks[1])
        self.wk, self.bk = mk_w(ks[2]), mk_b(ks[3])
        self.wv, self.bv = mk_w(ks[4]), mk_b(ks[5])
        self.wo, self.bo = mk_w(ks[6]), mk_b(ks[7])

        # Fused QKV projection weight/bias, cast to bf16 ONCE here.
        # 1/sqrt(hd) is folded into the Q slice (exact) so the attention kernel
        # never rescales q.
        scale = 1.0 / math.sqrt(self.head_dim)
        self.wqkv = jnp.concatenate(
            [self.wq * scale, self.wk, self.wv], axis=1).astype(compute_dtype)   # (C, 3C)
        self.bqkv = jnp.concatenate([self.bq * scale, self.bk, self.bv])          # (3C,) f32
        self.wo_c = self.wo.astype(compute_dtype)

    def __call__(self, x, past_kv=None):
        B, T, C = x.shape
        H, hd = self.num_heads, self.head_dim
        cdt = self.compute_dtype
        x2d = x.reshape(B * T, C).astype(cdt)          # bf16 activations at the boundary

        # Single fused QKV projection (x DMA'd once, lane-dense N=3C).
        qkv = linear(x2d, self.wqkv, self.bqkv)        # (B*T, 3C) bf16
        qkv = qkv.reshape(B, T, 3, H, hd)
        # TODO(synk): fold the head split into the projection out_specs /
        # attention in_specs; k/v layout is pinned to (B, H, S, hd) by the
        # past_kv cache format, so those transposes stay for now.
        q = qkv[:, :, 0].transpose(0, 2, 1, 3)         # (B, H, T, hd), pre-scaled
        k = qkv[:, :, 1].transpose(0, 2, 1, 3)
        v = qkv[:, :, 2].transpose(0, 2, 1, 3)

        if past_kv is not None:
            past_k, past_v = past_kv
            # TODO(synk): replace with a preallocated KV cache updated in place
            # via input_output_aliases + pl.ds (O(T_new)) instead of O(S) concat.
            k = jnp.concatenate([past_k.astype(cdt), k], axis=2)
            v = jnp.concatenate([past_v.astype(cdt), v], axis=2)

        attn = sdpa(q, k, v)                           # (B, T, C) — lane-dense, no transpose
        out = linear(attn.reshape(B * T, C), self.wo_c, self.bo, out_dtype=x.dtype)
        return out.reshape(B, T, C), (k, v)


# ------------------------------- reference ------------------------------------
def reference(mha, x, past_kv=None):
    B, T, C = x.shape
    H, hd = mha.num_heads, mha.head_dim
    q = (x @ mha.wq + mha.bq).reshape(B, T, H, hd).transpose(0, 2, 1, 3)
    k = (x @ mha.wk + mha.bk).reshape(B, T, H, hd).transpose(0, 2, 1, 3)
    v = (x @ mha.wv + mha.bv).reshape(B, T, H, hd).transpose(0, 2, 1, 3)
    if past_kv is not None:
        k = jnp.concatenate([past_kv[0], k], axis=2)
        v = jnp.concatenate([past_kv[1], v], axis=2)
    s = jnp.einsum("bhtd,bhsd->bhts", q, k) / math.sqrt(hd)
    p = jax.nn.softmax(s, axis=-1)
    a = jnp.einsum("bhts,bhsd->bhtd", p, v)
    a = a.transpose(0, 2, 1, 3).reshape(B, T, C)
    return a @ mha.wo + mha.bo, (k, v)


if __name__ == "__main__":
    B, T, d_model, num_heads = 2, 8, 32, 4
    hd = d_model // num_heads

    key = jax.random.PRNGKey(0)
    kx, kx2, kp = jax.random.split(key, 3)
    x = jax.random.normal(kx, (B, T, d_model), jnp.float32)

    mha = MultiHeadAttentionPallas(d_model, num_heads, kp)

    # --- prefill (no cache) ---
    out, (pres_k, pres_v) = mha(x)
    jax.block_until_ready(out)
    jax.block_until_ready(pres_k)
    jax.block_until_ready(pres_v)

    ref_out, (ref_k, ref_v) = reference(mha, x)
    assert out.shape == (B, T, d_model)
    assert pres_k.shape == (B, num_heads, T, hd)
    # bf16 compute path -> compare against the f32 reference with bf16-level
    # tolerances (values here have magnitude ~0.1, so atol dominates).
    assert jnp.allclose(out, ref_out, atol=1e-2, rtol=5e-2)
    assert jnp.allclose(pres_k.astype(jnp.float32), ref_k, atol=1e-2, rtol=5e-2)
    assert jnp.allclose(pres_v.astype(jnp.float32), ref_v, atol=1e-2, rtol=5e-2)

    # --- continuation with KV cache (S != T path) ---
    x2 = jax.random.normal(kx2, (B, T, d_model), jnp.float32)
    out2, (k2, v2) = mha(x2, past_kv=(pres_k, pres_v))
    jax.block_until_ready(out2)
    jax.block_until_ready(k2)

    ref_out2, (ref_k2, ref_v2) = reference(mha, x2, past_kv=(ref_k, ref_v))
    assert k2.shape == (B, num_heads, 2 * T, hd)
    assert jnp.allclose(out2, ref_out2, atol=1e-2, rtol=5e-2)
    assert jnp.allclose(k2.astype(jnp.float32), ref_k2, atol=1e-2, rtol=5e-2)
    assert jnp.allclose(v2.astype(jnp.float32), ref_v2, atol=1e-2, rtol=5e-2)

    print("KERNEL_OK")
</pallas_src>

<mosaic_0001>
module attributes {stable_mosaic.version = 11 : i64} {
  func.func @_linear_kernel(%arg0: i32, %arg1: i32, %arg2: i32, %arg3: memref<16x32xbf16, #tpu.memory_space<vmem>>, %arg4: memref<32x96xbf16, #tpu.memory_space<vmem>>, %arg5: memref<1x96xf32, #tpu.memory_space<vmem>>, %arg6: memref<16x96xbf16, #tpu.memory_space<vmem>>, %arg7: memref<16x96xf32, #tpu.memory_space<vmem>>) attributes {dimension_semantics = [#tpu.dimension_semantics<parallel>, #tpu.dimension_semantics<parallel>, #tpu.dimension_semantics<arbitrary>], iteration_bounds = array<i64: 1, 1, 1>, scalar_prefetch = 0 : i64, scratch_operands = 1 : i64, tpu.core_type = #tpu.core_type<tc>, window_params = [{transform_indices = @transform_0, window_bounds = array<i64: 16, 32>}, {transform_indices = @transform_1, window_bounds = array<i64: 32, 96>}, {transform_indices = @transform_2, window_bounds = array<i64: 1, 96>}, {transform_indices = @transform_3, window_bounds = array<i64: 16, 96>}]} {
    %c0_i32 = arith.constant 0 : i32
    %0 = arith.cmpi eq, %arg2, %c0_i32 : i32
    %1 = arith.extui %0 : i1 to i32
    %c0_i32_0 = arith.constant 0 : i32
    %2 = arith.cmpi ne, %1, %c0_i32_0 : i32
    scf.if %2 {
      %cst_10 = arith.constant 0.000000e+00 : f32
      %12 = vector.broadcast %cst_10 : f32 to vector<16x96xf32>
      %c0_11 = arith.constant 0 : index
      %c0_12 = arith.constant 0 : index
      %13 = vector.load %arg7[%c0_11, %c0_12] : memref<16x96xf32, #tpu.memory_space<vmem>>, vector<16x96xf32>
      tpu.vector_store %arg7[%c0_11, %c0_12], %12 {strides = array<i32>} : memref<16x96xf32, #tpu.memory_space<vmem>>, vector<16x96xf32>,
    } else {
    }
    %c0 = arith.constant 0 : index
    %c0_1 = arith.constant 0 : index
    %3 = vector.load %arg7[%c0, %c0_1] : memref<16x96xf32, #tpu.memory_space<vmem>>, vector<16x96xf32>
    %c0_2 = arith.constant 0 : index
    %c0_3 = arith.constant 0 : index
    %4 = vector.load %arg3[%c0_2, %c0_3] : memref<16x32xbf16, #tpu.memory_space<vmem>>, vector<16x32xbf16>
    %c0_4 = arith.constant 0 : index
    %c0_5 = arith.constant 0 : index
    %5 = vector.load %arg4[%c0_4, %c0_5] : memref<32x96xbf16, #tpu.memory_space<vmem>>, vector<32x96xbf16>
    %cst = arith.constant dense<0.000000e+00> : vector<16x96xf32>
    %6 = tpu.matmul %4, %5, %cst {dimension_numbers = #tpu.dot_dimension_numbers<[1], [0], [0], [1], [0, 0, 1, 1], [], []>} : vector<16x32xbf16>, vector<32x96xbf16>, vector<16x96xf32> -> vector<16x96xf32>
    %7 = arith.addf %3, %6 : vector<16x96xf32>
    %c0_6 = arith.constant 0 : index
    %c0_7 = arith.constant 0 : index
    %8 = vector.load %arg7[%c0_6, %c0_7] : memref<16x96xf32, #tpu.memory_space<vmem>>, vector<16x96xf32>
    tpu.vector_store %arg7[%c0_6, %c0_7], %7 {strides = array<i32>} : memref<16x96xf32, #tpu.memory_space<vmem>>, vector<16x96xf32>,
    %c0_i32_8 = arith.constant 0 : i32
    %9 = arith.cmpi eq, %arg2, %c0_i32_8 : i32
    %10 = arith.extui %9 : i1 to i32
    %c0_i32_9 = arith.constant 0 : i32
    %11 = arith.cmpi ne, %10, %c0_i32_9 : i32
    scf.if %11 {
      %c0_10 = arith.constant 0 : index
      %c0_11 = arith.constant 0 : index
      %12 = vector.load %arg7[%c0_10, %c0_11] : memref<16x96xf32, #tpu.memory_space<vmem>>, vector<16x96xf32>
      %c0_12 = arith.constant 0 : index
      %c0_13 = arith.constant 0 : index
      %13 = vector.load %arg5[%c0_12, %c0_13] : memref<1x96xf32, #tpu.memory_space<vmem>>, vector<1x96xf32>
      %14 = vector.broadcast %13 : vector<1x96xf32> to vector<16x96xf32>
      %15 = arith.addf %12, %14 : vector<16x96xf32>
      %16 = arith.truncf %15 : vector<16x96xf32> to vector<16x96xbf16>
      %c0_14 = arith.constant 0 : index
      %c0_15 = arith.constant 0 : index
      %17 = vector.load %arg6[%c0_14, %c0_15] : memref<16x96xbf16, #tpu.memory_space<vmem>>, vector<16x96xbf16>
      tpu.vector_store %arg6[%c0_14, %c0_15], %16 {strides = array<i32>} : memref<16x96xbf16, #tpu.memory_space<vmem>>, vector<16x96xbf16>,
    } else {
    }
    return
  }
  func.func @transform_0(%arg0: i32, %arg1: i32, %arg2: i32) -> (i32, i32) {
    %c0_i32 = arith.constant 0 : i32
    return %arg0, %arg2 : i32, i32
  }
  func.func @transform_1(%arg0: i32, %arg1: i32, %arg2: i32) -> (i32, i32) {
    %c0_i32 = arith.constant 0 : i32
    return %arg2, %arg1 : i32, i32
  }
  func.func @transform_2(%arg0: i32, %arg1: i32, %arg2: i32) -> (i32, i32) {
    %c0_i32 = arith.constant 0 : i32
    %c0_i32_0 = arith.constant 0 : i32
    return %c0_i32, %arg1 : i32, i32
  }
  func.func @transform_3(%arg0: i32, %arg1: i32, %arg2: i32) -> (i32, i32) {
    %c0_i32 = arith.constant 0 : i32
    return %arg0, %arg1 : i32, i32
  }
}

</mosaic_0001>

<bundles_post_ra>
// kernel: tpu_custom_call.1
= control target key start
LH: loop header
LB: loop body
LE: loop exit
PB: predicated region body
PF: predicated region fallthrough
CT: control target
= control target key end

     0   :  { %8 = vsyncpa [#allocation4], 0  ;;  %s291_s0 = inlined_call_operand.hbm [shape: bf16[16,32], index: 0, kind: input, shape index: {}]   ;;  %s292_s1 = inlined_call_operand.hbm [shape: bf16[32,96], index: 1, kind: input, shape index: {}]   ;;  %s293_s2 = inlined_call_operand.vmem [shape: f32[1,96], index: 2, kind: input, shape index: {}]   ;;  %s294_s3 = inlined_call_operand.hbm [shape: bf16[16,96], index: 3, kind: output, shape index: {}]  }
   0x1   :  { %9 = vsyncpa [#allocation7], 0 }
   0x2   :  { %10 = vsyncpa [#allocation5], 0  ;;  %s15_s14 = sshll.u32 %s291_s0, 4  ;;  %s240_s15 = smov [#allocation3]   ;;  %s16_s14 = int_to_ptr.hbm [resolvable:$true] %s15_s14 }
   0x3   :  { %s17_s16 = sshll.u32 %s240_s15, 4  ;;  %s28_s19 = sshll.u32 %s292_s1, 4  ;;  %s18_s16 = int_to_ptr.vmem [resolvable:$true] %s17_s16  ;;  %s29_s19 = int_to_ptr.hbm [resolvable:$true] %s28_s19 }
   0x4   :  { %s241_s20 = smov 64   ;;  %s242_s21 = smov 4  }
   0x5   :  { %23 = dma.hbm_to_vmem [thread:$0]  %s16_s14, 128, %s18_s16, [#allocation4], %s241_s20, %s241_s20, %s242_s21  }
   0x6   :  { %s243_s22 = smov [#allocation6]  }
   0x7   :  { %s30_s23 = sshll.u32 %s243_s22, 4  ;;  %s31_s23 = int_to_ptr.vmem [resolvable:$true] %s30_s23 }
   0x8   :  { %36 = dma.hbm_to_vmem [thread:$0]  %s29_s19, 256, %s31_s23, [#allocation7], %s241_s20, %s241_s20, %s242_s21  }
   0x9   :  { %234 = dma.done.wait [#allocation4], 128  }
   0xa   :  { %235 = vsyncadd [#allocation4], 4294967168 }
   0xb   :  { %236 = dma.done.wait [#allocation7], 256  }
   0xc   :  { %237 = vsyncadd [#allocation7], 4294967040  ;;  %vm52_vm0 = vcmask 785408   ;;  %v244_v0 = vmov 0.0   ;;  %v154_v1 = vld [vmem:[#allocation6 + $0x8] sm:$0xff]  ;;  %v153_v2 = vld [vmem:[#allocation6] sm:$0xff] }
   0xd   :  { %53 = vst.msk [vmem:[#allocation2] sm:$0xff] %vm52_vm0, %v244_v0  ;;  %90 = vmatpush.bf16.msra.mxu0 %v154_v1  ;;  %v152_v3 = vld [vmem:[#allocation3] sm:$0xff]  ;;  %vm80_vm1 = vcmask 261120   ;;  %v161_v8 = vld [vmem:[%s293_s2] ss:$0 sm:$0xff]  ;;  %vm116_vm2 = vcmask 781312  }
   0xe   :  { %54 = vst.msk [vmem:[#allocation2 + $0x8] sm:$0xff] %vm52_vm0, %v244_v0  ;;  %s245_s24 = smov [#allocation8]   ;;  %s125_s28 = sshll.u32 %s294_s3, 4  ;;  %s126_s28 = int_to_ptr.hbm [resolvable:$true] %s125_s28 }
   0xf   :  { %s123_s25 = sshll.u32 %s245_s24, 4  ;;  %s124_s25 = int_to_ptr.vmem [resolvable:$true] %s123_s25 }
  0x11   :  { %91 = vmatpush.bf16.msra.mxu0 %v153_v2 }
  0x14   :  { %151 = vmatmul.msk.bf16.vlgmr.msra.gmra.mxu0 %vm80_vm1, %v152_v3  ;;  %v55_v4 = vld [vmem:[#allocation2] sm:$0xff] }
  0x15   :  { %v56_v7 = vld [vmem:[#allocation2 + $0x8] sm:$0xff] }
  0x91   :  { %v93_v5 = vpop.f32.mrf.mxu0 }
  0x92   :  { %v98_v6 = vadd.f32 %v93_v5, %v55_v4 }
  0x94   :  { %101 = vst.msk [vmem:[#allocation2] sm:$0xff] %vm52_vm0, %v98_v6 }
  0x99   :  { %v95_v9 = vpop.f32.mrf.mxu0 }
  0x9a   :  { %v99_v10 = vadd.f32 %v95_v9, %v56_v7 }
  0x9b   :  { %v106_v11 = vld [vmem:[#allocation2] sm:$0xff] }
  0x9c   :  { %102 = vst.msk [vmem:[#allocation2 + $0x8] sm:$0xff] %vm52_vm0, %v99_v10  ;;  %v112_v12 = vadd.f32 %v161_v8, %v106_v11 }
  0x9e   :  { %v114_v13 = vpack.c.bf16 %v112_v12, %v112_v12 }
  0xa0   :  { %117 = vst.msk [vmem:[#allocation8] sm:$0xf] %vm116_vm2, %v114_v13 }
  0xa3   :  { %v107_v14 = vld [vmem:[#allocation2 + $0x8] sm:$0xff] }
  0xa4   :  { %v113_v15 = vadd.f32 %v161_v8, %v107_v14 }
  0xa6   :  { %v115_v16 = vpack.c.bf16 %v113_v15, %v113_v15 }
  0xa8   :  { %118 = vst.msk [vmem:[#allocation8 + $0x4] sm:$0xf] %vm116_vm2, %v115_v16 }
  0xa9   :  { %131 = dma.vmem_to_hbm [thread:$0]  %s124_s25, 128, %s126_s28, [#allocation5], %s241_s20, %s241_s20, %s242_s21  }
  0xaa   :  { %238 = dma.done.wait [#allocation5], 128  }
  0xab   :  { %239 = vsyncadd [#allocation5], 4294967168 }
  0xac   :  { %136 = vsyncpa [#allocation4], 1 }
  0xad   :  { %137 = vsyncpa [#allocation7], 1 }
  0xae   :  { %138 = vsyncpa [#allocation5], 1 }

</bundles_post_ra>
